<compile_context>
chip_gen: v5e
topology: v5e:2x2
jax: 0.10.0
libtpu: 0.0.40
codegen_flags: <defaults>
</compile_context>

<pallas_src>
import functools

import jax
import jax.numpy as jnp
from jax.experimental import pallas as pl
from jax.experimental.pallas import tpu as pltpu

LANE = 128            # vreg lane width
ROW_PACK = 16         # bf16 packs 16 rows / vreg — pad tiny batches to this
# v7x has 64 MiB VMEM per TensorCore (half of v5e/v6e); stay well below it.
_VMEM_LIMIT_BYTES = 48 * 1024 * 1024


def _round_up(n, m):
    return ((n + m - 1) // m) * m


def _pad2(x, rows, cols):
    r, c = x.shape
    if r == rows and c == cols:
        return x
    return jnp.pad(x, ((0, rows - r), (0, cols - c)))


def _k_tile(k_pad):
    """Contraction (k_in) tile: full axis if tiny, else a 128-aligned chunk."""
    if k_pad <= LANE:
        return k_pad
    for tk in (512, 256, 128):
        if k_pad % tk == 0 and k_pad // tk >= 2:
            return tk
    return k_pad


def _queue_row_tile(rows):
    """Row tile for the queue projection: multiple of 16, >=2 blocks if possible."""
    for tm in (512, 256, 128, 64, 32, 16):
        if rows % tm == 0 and rows // tm >= 2:
            return tm
    return rows


# ----------------------------- Pallas kernels ------------------------------

def _l2_normalize(y):
    # F.normalize(y, dim=1): y * rsqrt(max(||y||^2, 1e-24))  (EUP rsqrt, no div)
    ss = jnp.sum(y * y, axis=-1, keepdims=True)
    return y * jax.lax.rsqrt(jnp.maximum(ss, 1e-24))


def _fused_query_key_kernel(xq_ref, xk_ref, w1q_ref, w1k_ref, b1q_ref, b1k_ref,
                            wh_ref, bh_ref, logit_ref, emb_ref, featk_ref,
                            accq_ref, acck_ref, *, c_pad):
    """encoder_q L1+ReLU, combined (logits || embed_q) head + L2 norm, and
    encoder_k L1+ReLU — one call, k_in-tiled with f32 VMEM accumulators."""
    k = pl.program_id(0)

    @pl.when(k == 0)
    def _():
        accq_ref[...] = jnp.zeros_like(accq_ref)
        acck_ref[...] = jnp.zeros_like(acck_ref)

    # Activations arrive f32 and are cast to bf16 in-kernel (no wrapper cast
    # pass); weights are already stored bf16.  Accumulate in f32.
    accq_ref[...] += jnp.dot(xq_ref[...].astype(jnp.bfloat16), w1q_ref[...],
                             preferred_element_type=jnp.float32)
    acck_ref[...] += jnp.dot(xk_ref[...].astype(jnp.bfloat16), w1k_ref[...],
                             preferred_element_type=jnp.float32)

    @pl.when(k == pl.num_programs(0) - 1)
    def _():
        feat_q = jnp.maximum(accq_ref[...] + b1q_ref[...], 0.0)
        feat_k = jnp.maximum(acck_ref[...] + b1k_ref[...], 0.0)
        featk_ref[...] = feat_k.astype(featk_ref.dtype)
        # One 256-lane head matmul (logits || embed) fills the 256-wide MXU;
        # the lane split at c_pad (=128) is vreg-aligned and free.
        head = jnp.dot(feat_q.astype(jnp.bfloat16), wh_ref[...],
                       preferred_element_type=jnp.float32) + bh_ref[...]
        logit_ref[...] = head[:, :c_pad].astype(logit_ref.dtype)
        emb_ref[...] = _l2_normalize(head[:, c_pad:]).astype(emb_ref.dtype)


def _enqueue_kernel(ptr_ref, q_in_ref, feat_ref, q_out_ref, sem):
    """Write only the bs freshly-computed rows into the (aliased) HBM queue."""
    del q_in_ref  # same HBM buffer as q_out_ref via input_output_aliases
    rows = feat_ref.shape[0]
    cp = pltpu.make_async_copy(feat_ref, q_out_ref.at[pl.ds(ptr_ref[0], rows)], sem)
    cp.start()
    cp.wait()


def _linear_l2norm_kernel(x_ref, w_ref, b_ref, o_ref):
    """o = F.normalize(x @ w + b, dim=1) — queue projection, row-tiled."""
    y = jnp.dot(x_ref[...].astype(jnp.bfloat16), w_ref[...],
                preferred_element_type=jnp.float32)
    o_ref[...] = _l2_normalize(y + b_ref[...]).astype(o_ref.dtype)


# ------------------------------ Pallas wrappers ------------------------------

def fused_query_key_forward(x_q, x_k, w1q, b1q, w_head, b_head, w1k, b1k,
                            *, c_pad, d_pad):
    """Fused query path + key feature layer.  Returns (logits_pad, embed_pad,
    feat_k_pad) with lane/row padding still in place."""
    k_pad, feat_dim = w1q.shape
    head_pad = w_head.shape[1]
    mq = _round_up(x_q.shape[0], ROW_PACK)
    mk = _round_up(x_k.shape[0], ROW_PACK)
    xq = _pad2(x_q, mq, k_pad)
    xk = _pad2(x_k, mk, k_pad)
    tk = _k_tile(k_pad)
    nk = k_pad // tk

    kernel = functools.partial(_fused_query_key_kernel, c_pad=c_pad)
    logit, emb, featk = pl.pallas_call(
        kernel,
        out_shape=(jax.ShapeDtypeStruct((mq, c_pad), jnp.float32),
                   jax.ShapeDtypeStruct((mq, d_pad), jnp.float32),
                   jax.ShapeDtypeStruct((mk, feat_dim), jnp.float32)),
        grid=(nk,),
        in_specs=[
            pl.BlockSpec((mq, tk), lambda k: (0, k)),
            pl.BlockSpec((mk, tk), lambda k: (0, k)),
            pl.BlockSpec((tk, feat_dim), lambda k: (k, 0)),
            pl.BlockSpec((tk, feat_dim), lambda k: (k, 0)),
            pl.BlockSpec((1, feat_dim), lambda k: (0, 0)),
            pl.BlockSpec((1, feat_dim), lambda k: (0, 0)),
            pl.BlockSpec((feat_dim, head_pad), lambda k: (0, 0)),
            pl.BlockSpec((1, head_pad), lambda k: (0, 0)),
        ],
        out_specs=(
            pl.BlockSpec((mq, c_pad), lambda k: (0, 0)),
            pl.BlockSpec((mq, d_pad), lambda k: (0, 0)),
            pl.BlockSpec((mk, feat_dim), lambda k: (0, 0)),
        ),
        scratch_shapes=[pltpu.VMEM((mq, feat_dim), jnp.float32),
                        pltpu.VMEM((mk, feat_dim), jnp.float32)],
        compiler_params=pltpu.CompilerParams(
            dimension_semantics=("arbitrary",),
            vmem_limit_bytes=_VMEM_LIMIT_BYTES),
    )(xq, xk, w1q, w1k, b1q, b1k, w_head, b_head)
    return logit, emb, featk


def enqueue_rows(queue_k, feat_new, ptr_vec):
    """queue_k[ptr:ptr+bs] = feat_new, writing only the bs new rows (queue_k is
    aliased in->out; with buffer donation in a training loop this is in-place)."""
    rows_k, feat_dim = queue_k.shape
    bs_rows = feat_new.shape[0]
    return pl.pallas_call(
        _enqueue_kernel,
        out_shape=jax.ShapeDtypeStruct((rows_k, feat_dim), queue_k.dtype),
        grid=(1,),
        in_specs=[
            pl.BlockSpec(memory_space=pltpu.MemorySpace.SMEM),   # ptr
            pl.BlockSpec(memory_space=pl.ANY),                   # queue (HBM)
            pl.BlockSpec((bs_rows, feat_dim), lambda i: (0, 0)),  # new rows
        ],
        out_specs=pl.BlockSpec(memory_space=pl.ANY),
        scratch_shapes=[pltpu.SemaphoreType.DMA],
        input_output_aliases={1: 0},
        compiler_params=pltpu.CompilerParams(
            vmem_limit_bytes=_VMEM_LIMIT_BYTES),
    )(ptr_vec, queue_k, feat_new)


def queue_project_forward(queue, w_bf16, b, *, dim):
    """F.normalize(Linear(queue), dim=1), row-tiled over the queue."""
    rows, feat_dim = queue.shape
    d_pad = w_bf16.shape[1]
    tm = _queue_row_tile(rows)
    out = pl.pallas_call(
        _linear_l2norm_kernel,
        out_shape=jax.ShapeDtypeStruct((rows, d_pad), jnp.float32),
        grid=(rows // tm,),
        in_specs=[
            pl.BlockSpec((tm, feat_dim), lambda i: (i, 0)),
            pl.BlockSpec((feat_dim, d_pad), lambda i: (0, 0)),
            pl.BlockSpec((1, d_pad), lambda i: (0, 0)),
        ],
        out_specs=pl.BlockSpec((tm, d_pad), lambda i: (i, 0)),
        compiler_params=pltpu.CompilerParams(
            dimension_semantics=("parallel",),
            vmem_limit_bytes=_VMEM_LIMIT_BYTES),
    )(queue, w_bf16, b)
    return out[:, :dim]


# ------------------------------ model pieces -------------------------------

def init_linear(key, fan_in, fan_out):
    """Deterministic nn.Linear-style init (uniform +/- 1/sqrt(fan_in))."""
    kw, kb = jax.random.split(key)
    bound = 1.0 / jnp.sqrt(jnp.float32(fan_in))
    w = jax.random.uniform(kw, (fan_in, fan_out), jnp.float32, -bound, bound)
    b = jax.random.uniform(kb, (fan_out,), jnp.float32, -bound, bound)
    return w, b


def prepare_query_constants(state):
    """bf16 / fused-head working copies of the (trained) query-side params.
    In a training loop refresh these once per optimizer step, not per forward."""
    return dict(
        w1=state["enc_q"]["w1"].astype(jnp.bfloat16),
        b1=state["enc_q"]["b1"],
        w_head=jnp.concatenate([state["enc_q"]["w2"], state["embed_q_w"]],
                               axis=1).astype(jnp.bfloat16),
        b_head=jnp.concatenate([state["enc_q"]["b2"], state["embed_q_b"]],
                               axis=1),
    )


def moco_train_forward(state, qconst, im_cls, im_q, im_k, labels, in_idx,
                       shuffle_key, *, num_classes, dim, K):
    """MoCo._train (wo_base enqueue path, single device).

    Returns ((query, key, k_labels, k_idx, logit_q), new_state).
    """
    bs = im_q.shape[0]
    assert K % bs == 0  # invariant asserted by the reference module
    m = state["m"]
    del in_idx  # unused by the wo_base dequeue/enqueue path (queue_i untouched)

    def flat(a):
        return a.reshape(a.shape[0], -1)

    # ---- momentum update of key encoder / key embed (no_grad buffer op) ----
    mom = lambda pk, pq: pk * m + pq * (1.0 - m)
    enc_k = jax.tree_util.tree_map(mom, state["enc_k"], state["enc_q"])
    embed_k_w = mom(state["embed_k_w"], state["embed_q_w"])
    embed_k_b = mom(state["embed_k_b"], state["embed_q_b"])

    # ---- batch shuffle (single device: all_gather / broadcast == identity) ----
    idx_shuffle = jax.random.permutation(shuffle_key, bs)
    idx_unshuffle = jnp.argsort(idx_shuffle)
    im_k_s = im_k[idx_shuffle]
    labels_s = labels[idx_shuffle]

    # ---- fused query path + key features: one pallas_call ----
    c_pad = state["enc_q"]["w2"].shape[1]
    d_pad = state["embed_q_w"].shape[1]
    x_q = jnp.concatenate([flat(im_cls), flat(im_q)], axis=0)
    x_k = flat(im_k_s)
    logit_all, embed_all, featk_all = fused_query_key_forward(
        x_q, x_k,
        qconst["w1"], qconst["b1"], qconst["w_head"], qconst["b_head"],
        enc_k["w1"].astype(jnp.bfloat16), enc_k["b1"],
        c_pad=c_pad, d_pad=d_pad)
    logit_q = logit_all[:bs, :num_classes]
    embed_q = embed_all[bs:2 * bs, :dim]     # F.normalize(embed_q(feat_q), dim=1)
    feat_k = featk_all[:bs]
    # TODO(synk): the reference also computes normalize(embed_k(feat_k)) and
    # batch-unshuffles it, but that tensor is never returned, never enqueued
    # and never read again -> dead code, elided.

    labels_u = labels_s[idx_unshuffle]       # unshuffle(shuffle(labels)) == labels

    # ---- dequeue & enqueue (wo_base): write only the bs new rows.  Note the
    # reference enqueues feat_k in *shuffled* order (only labels are
    # unshuffled) — reproduced as-is.
    ptr = state["queue_ptr"][0]
    queue_k = enqueue_rows(state["queue_k"], feat_k, state["queue_ptr"][0:1])
    queue_l = jax.lax.dynamic_update_slice(state["queue_l"], labels_u, (ptr,))
    queue_ptr = state["queue_ptr"].at[0].set((ptr + bs) % K)

    # ---- project & normalize the whole (updated) queue ----
    embed_b = queue_project_forward(queue_k, embed_k_w.astype(jnp.bfloat16),
                                    embed_k_b, dim=dim)

    new_state = dict(state)
    new_state.update(enc_k=enc_k, embed_k_w=embed_k_w, embed_k_b=embed_k_b,
                     queue_k=queue_k, queue_l=queue_l, queue_ptr=queue_ptr)
    return (embed_q, embed_b, queue_l, state["queue_i"], logit_q), new_state


# --------------------------- pure-JAX f32 reference ---------------------------

def reference_forward(state, im_cls, im_q, im_k, labels, shuffle_key,
                      *, num_classes, dim, K):
    bs = im_q.shape[0]
    m = state["m"]
    mom = lambda pk, pq: pk * m + pq * (1.0 - m)
    enc_k = jax.tree_util.tree_map(mom, state["enc_k"], state["enc_q"])
    ek_w = mom(state["embed_k_w"], state["embed_q_w"])
    ek_b = mom(state["embed_k_b"], state["embed_q_b"])

    def flat(a):
        return a.reshape(a.shape[0], -1)

    def norm(v):
        return v / jnp.maximum(jnp.linalg.norm(v, axis=1, keepdims=True), 1e-12)

    x_q = jnp.concatenate([flat(im_cls), flat(im_q)], axis=0)
    k_in = x_q.shape[1]
    feat_q = jnp.maximum(x_q @ state["enc_q"]["w1"][:k_in] + state["enc_q"]["b1"], 0.0)
    logit_q = (feat_q @ state["enc_q"]["w2"] + state["enc_q"]["b2"])[:bs, :num_classes]
    embed_q = norm((feat_q @ state["embed_q_w"] + state["embed_q_b"])[bs:, :dim])

    perm = jax.random.permutation(shuffle_key, bs)
    inv = jnp.argsort(perm)
    x_k = flat(im_k[perm])
    feat_k = jnp.maximum(x_k @ enc_k["w1"][:k_in] + enc_k["b1"], 0.0)
    labels_u = labels[perm][inv]

    ptr = state["queue_ptr"][0]
    queue_k = jax.lax.dynamic_update_slice(state["queue_k"], feat_k, (ptr, 0))
    queue_l = jax.lax.dynamic_update_slice(state["queue_l"], labels_u, (ptr,))
    embed_b = norm((queue_k @ ek_w + ek_b)[:, :dim])
    return embed_q, embed_b, queue_l, logit_q, queue_k, (ptr + bs) % K


# ----------------------------------- main -----------------------------------

if __name__ == "__main__":
    master = jax.random.PRNGKey(0)
    keys = jax.random.split(master, 12)

    # small shapes consistent with the module's forward
    bs, C, H, W = 4, 3, 8, 8
    in_dim = C * H * W            # 192
    feat_dim = 128                # feat_dim == feat_t (default)
    dim = 32                      # embedding dim
    num_classes = 16
    K = 64                        # queue size
    m = 0.999
    assert K % bs == 0

    k_pad = _round_up(in_dim, LANE)
    c_pad = _round_up(num_classes, LANE)
    d_pad = _round_up(dim, LANE)

    # encoder_q params (stored lane/contraction-padded once, zeros in the pad);
    # encoder_k is a copy of encoder_q (as in __init__)
    w1, b1 = init_linear(keys[0], in_dim, feat_dim)
    w2, b2 = init_linear(keys[1], feat_dim, num_classes)
    ew, eb = init_linear(keys[2], feat_dim, dim)
    enc_q = dict(
        w1=jnp.pad(w1, ((0, k_pad - in_dim), (0, 0))),
        b1=b1.reshape(1, feat_dim),
        w2=jnp.pad(w2, ((0, 0), (0, c_pad - num_classes))),
        b2=jnp.pad(b2, (0, c_pad - num_classes)).reshape(1, c_pad),
    )
    enc_k = jax.tree_util.tree_map(lambda p: p, enc_q)
    embed_q_w = jnp.pad(ew, ((0, 0), (0, d_pad - dim)))
    embed_q_b = jnp.pad(eb, (0, d_pad - dim)).reshape(1, d_pad)
    embed_k_w, embed_k_b = embed_q_w, embed_q_b

    # registered buffers
    queue_k = jax.random.normal(keys[3], (K, feat_dim), jnp.float32)
    queue_k = queue_k / jnp.maximum(
        jnp.linalg.norm(queue_k, axis=1, keepdims=True), 1e-12)
    queue_l = jax.random.randint(keys[4], (K,), 0, num_classes, dtype=jnp.int32)
    queue_i = jnp.arange(-K, 0, dtype=jnp.int32)
    queue_ptr = jnp.zeros((num_classes,), jnp.int32)   # shape matches the module

    state = dict(m=m, enc_q=enc_q, enc_k=enc_k,
                 embed_q_w=embed_q_w, embed_q_b=embed_q_b,
                 embed_k_w=embed_k_w, embed_k_b=embed_k_b,
                 queue_k=queue_k, queue_l=queue_l, queue_i=queue_i,
                 queue_ptr=queue_ptr)

    # inputs (NCHW images, per the PyTorch convention)
    im_cls = jax.random.normal(keys[5], (bs, C, H, W), jnp.float32)
    im_q = jax.random.normal(keys[6], (bs, C, H, W), jnp.float32)
    im_k = jax.random.normal(keys[7], (bs, C, H, W), jnp.float32)
    labels = jax.random.randint(keys[8], (bs,), 0, num_classes, dtype=jnp.int32)
    in_idx = jnp.arange(bs, dtype=jnp.int32)
    shuffle_key = keys[9]

    qconst = prepare_query_constants(state)
    step = jax.jit(functools.partial(moco_train_forward,
                                     num_classes=num_classes, dim=dim, K=K))
    outs, new_state = step(state, qconst, im_cls, im_q, im_k, labels, in_idx,
                           shuffle_key)
    query, key_out, k_labels, k_idx, logit_q = jax.block_until_ready(outs)
    new_state = jax.block_until_ready(new_state)

    # ---- shape / buffer invariants ----
    assert query.shape == (bs, dim)
    assert key_out.shape == (K, dim)
    assert k_labels.shape == (K,)
    assert k_idx.shape == (K,)
    assert logit_q.shape == (bs, num_classes)
    assert int(new_state["queue_ptr"][0]) == bs % K
    assert bool(jnp.all(k_idx == jnp.arange(-K, 0, dtype=jnp.int32)))
    # rows of query / key are unit-norm (F.normalize semantics)
    assert bool(jnp.all(jnp.abs(jnp.linalg.norm(query, axis=1) - 1.0) < 1e-3))
    assert bool(jnp.all(jnp.abs(jnp.linalg.norm(key_out, axis=1) - 1.0) < 1e-3))

    # ---- compare against a pure-JAX f32 reference (bf16 MXU tolerance) ----
    ref_q, ref_b, ref_l, ref_logit, ref_qk, ref_ptr = reference_forward(
        state, im_cls, im_q, im_k, labels, shuffle_key,
        num_classes=num_classes, dim=dim, K=K)
    ATOL = 0.1

    def _max_err(a, b):
        return float(jnp.max(jnp.abs(a.astype(jnp.float32) - b.astype(jnp.float32))))

    assert _max_err(query, ref_q) < ATOL
    assert _max_err(key_out, ref_b) < ATOL
    assert _max_err(logit_q, ref_logit) < ATOL
    assert _max_err(new_state["queue_k"], ref_qk) < ATOL
    assert bool(jnp.all(k_labels == ref_l))
    assert int(new_state["queue_ptr"][0]) == int(ref_ptr)

    print("KERNEL_OK")
</pallas_src>

<mosaic_0001>
module attributes {stable_mosaic.version = 11 : i64} {
  func.func @_enqueue_kernel(%arg0: i32, %arg1: memref<1xi32, #tpu.memory_space<smem>>, %arg2: memref<64x128xf32, #tpu.memory_space<any>>, %arg3: memref<4x128xf32, #tpu.memory_space<vmem>>, %arg4: memref<64x128xf32, #tpu.memory_space<any>>, %arg5: memref<!tpu.dma_semaphore, #tpu.memory_space<semaphore_mem>>) attributes {dimension_semantics = [#tpu.dimension_semantics<arbitrary>], iteration_bounds = array<i64: 1>, scalar_prefetch = 0 : i64, scratch_operands = 1 : i64, tpu.core_type = #tpu.core_type<tc>, window_params = [{transform_indices = @transform_0, window_bounds = array<i64: 1>}, {}, {pipeline_mode = #tpu.pipeline_mode<synchronous>, transform_indices = @transform_2, window_bounds = array<i64: 4, 128>}, {}]} {
    %c0 = arith.constant 0 : index
    %0 = memref.load %arg1[%c0] : memref<1xi32, #tpu.memory_space<smem>>
    %c0_i32 = arith.constant 0 : i32
    %1 = tpu.memref_slice %arg4[%0, %c0_i32] : memref<64x128xf32, #tpu.memory_space<any>> -> memref<4x128xf32, #tpu.memory_space<any>>
    tpu.enqueue_dma source(%arg3 : memref<4x128xf32, #tpu.memory_space<vmem>>) target(%1 : memref<4x128xf32, #tpu.memory_space<any>>) target_semaphore(%arg5 : memref<!tpu.dma_semaphore, #tpu.memory_space<semaphore_mem>>)
    %c0_i32_0 = arith.constant 0 : i32
    %2 = tpu.memref_slice %arg4[%0, %c0_i32_0] : memref<64x128xf32, #tpu.memory_space<any>> -> memref<4x128xf32, #tpu.memory_space<any>>
    tpu.wait_dma2 semaphore(%arg5 : memref<!tpu.dma_semaphore, #tpu.memory_space<semaphore_mem>>) src(%arg3 : memref<4x128xf32, #tpu.memory_space<vmem>>) dst(%2 : memref<4x128xf32, #tpu.memory_space<any>>)
    return
  }
  func.func @transform_0(%arg0: i32) -> i32 {
    %c0_i32 = arith.constant 0 : i32
    %c0_i32_0 = arith.constant 0 : i32
    return %c0_i32 : i32
  }
  func.func @transform_2(%arg0: i32) -> (i32, i32) {
    %c0_i32 = arith.constant 0 : i32
    %c0_i32_0 = arith.constant 0 : i32
    %c0_i32_1 = arith.constant 0 : i32
    return %c0_i32, %c0_i32_0 : i32, i32
  }
}

module attributes {stable_mosaic.version = 11 : i64} {
  func.func @_fused_query_key_kernel(%arg0: i32, %arg1: memref<16x128xf32, #tpu.memory_space<vmem>>, %arg2: memref<16x128xf32, #tpu.memory_space<vmem>>, %arg3: memref<128x128xbf16, #tpu.memory_space<vmem>>, %arg4: memref<128x128xbf16, #tpu.memory_space<vmem>>, %arg5: memref<1x128xf32, #tpu.memory_space<vmem>>, %arg6: memref<1x128xf32, #tpu.memory_space<vmem>>, %arg7: memref<128x256xbf16, #tpu.memory_space<vmem>>, %arg8: memref<1x256xf32, #tpu.memory_space<vmem>>, %arg9: memref<16x128xf32, #tpu.memory_space<vmem>>, %arg10: memref<16x128xf32, #tpu.memory_space<vmem>>, %arg11: memref<16x128xf32, #tpu.memory_space<vmem>>, %arg12: memref<16x128xf32, #tpu.memory_space<vmem>>, %arg13: memref<16x128xf32, #tpu.memory_space<vmem>>) attributes {dimension_semantics = [#tpu.dimension_semantics<arbitrary>], iteration_bounds = array<i64: 2>, scalar_prefetch = 0 : i64, scratch_operands = 2 : i64, tpu.core_type = #tpu.core_type<tc>, window_params = [{transform_indices = @transform_0, window_bounds = array<i64: 16, 128>}, {transform_indices = @transform_1, window_bounds = array<i64: 16, 128>}, {transform_indices = @transform_2, window_bounds = array<i64: 128, 128>}, {transform_indices = @transform_3, window_bounds = array<i64: 128, 128>}, {pipeline_mode = #tpu.pipeline_mode<synchronous>, transform_indices = @transform_4, window_bounds = array<i64: 1, 128>}, {pipeline_mode = #tpu.pipeline_mode<synchronous>, transform_indices = @transform_5, window_bounds = array<i64: 1, 128>}, {pipeline_mode = #tpu.pipeline_mode<synchronous>, transform_indices = @transform_6, window_bounds = array<i64: 128, 256>}, {pipeline_mode = #tpu.pipeline_mode<synchronous>, transform_indices = @transform_7, window_bounds = array<i64: 1, 256>}, {pipeline_mode = #tpu.pipeline_mode<synchronous>, transform_indices = @transform_8, window_bounds = array<i64: 16, 128>}, {pipeline_mode = #tpu.pipeline_mode<synchronous>, transform_indices = @transform_9, window_bounds = array<i64: 16, 128>}, {pipeline_mode = #tpu.pipeline_mode<synchronous>, transform_indices = @transform_10, window_bounds = array<i64: 16, 128>}]} {
    %c0_i32 = arith.constant 0 : i32
    %0 = arith.cmpi eq, %arg0, %c0_i32 : i32
    %1 = arith.extui %0 : i1 to i32
    %c0_i32_0 = arith.constant 0 : i32
    %2 = arith.cmpi ne, %1, %c0_i32_0 : i32
    scf.if %2 {
      %cst_18 = arith.constant 0.000000e+00 : f32
      %20 = vector.broadcast %cst_18 : f32 to vector<16x128xf32>
      %c0_19 = arith.constant 0 : index
      %c0_20 = arith.constant 0 : index
      %21 = vector.load %arg12[%c0_19, %c0_20] : memref<16x128xf32, #tpu.memory_space<vmem>>, vector<16x128xf32>
      tpu.vector_store %arg12[%c0_19, %c0_20], %20 {strides = array<i32>} : memref<16x128xf32, #tpu.memory_space<vmem>>, vector<16x128xf32>,
      %cst_21 = arith.constant 0.000000e+00 : f32
      %22 = vector.broadcast %cst_21 : f32 to vector<16x128xf32>
      %c0_22 = arith.constant 0 : index
      %c0_23 = arith.constant 0 : index
      %23 = vector.load %arg13[%c0_22, %c0_23] : memref<16x128xf32, #tpu.memory_space<vmem>>, vector<16x128xf32>
      tpu.vector_store %arg13[%c0_22, %c0_23], %22 {strides = array<i32>} : memref<16x128xf32, #tpu.memory_space<vmem>>, vector<16x128xf32>,
    } else {
    }
    %c0 = arith.constant 0 : index
    %c0_1 = arith.constant 0 : index
    %3 = vector.load %arg12[%c0, %c0_1] : memref<16x128xf32, #tpu.memory_space<vmem>>, vector<16x128xf32>
    %c0_2 = arith.constant 0 : index
    %c0_3 = arith.constant 0 : index
    %4 = vector.load %arg1[%c0_2, %c0_3] : memref<16x128xf32, #tpu.memory_space<vmem>>, vector<16x128xf32>
    %5 = arith.truncf %4 : vector<16x128xf32> to vector<16x128xbf16>
    %c0_4 = arith.constant 0 : index
    %c0_5 = arith.constant 0 : index
    %6 = vector.load %arg3[%c0_4, %c0_5] : memref<128x128xbf16, #tpu.memory_space<vmem>>, vector<128x128xbf16>
    %cst = arith.constant dense<0.000000e+00> : vector<16x128xf32>
    %7 = tpu.matmul %5, %6, %cst {dimension_numbers = #tpu.dot_dimension_numbers<[1], [0], [0], [1], [0, 0, 1, 1], [], []>} : vector<16x128xbf16>, vector<128x128xbf16>, vector<16x128xf32> -> vector<16x128xf32>
    %8 = arith.addf %3, %7 : vector<16x128xf32>
    %c0_6 = arith.constant 0 : index
    %c0_7 = arith.constant 0 : index
    %9 = vector.load %arg12[%c0_6, %c0_7] : memref<16x128xf32, #tpu.memory_space<vmem>>, vector<16x128xf32>
    tpu.vector_store %arg12[%c0_6, %c0_7], %8 {strides = array<i32>} : memref<16x128xf32, #tpu.memory_space<vmem>>, vector<16x128xf32>,
    %c0_8 = arith.constant 0 : index
    %c0_9 = arith.constant 0 : index
    %10 = vector.load %arg13[%c0_8, %c0_9] : memref<16x128xf32, #tpu.memory_space<vmem>>, vector<16x128xf32>
    %c0_10 = arith.constant 0 : index
    %c0_11 = arith.constant 0 : index
    %11 = vector.load %arg2[%c0_10, %c0_11] : memref<16x128xf32, #tpu.memory_space<vmem>>, vector<16x128xf32>
    %12 = arith.truncf %11 : vector<16x128xf32> to vector<16x128xbf16>
    %c0_12 = arith.constant 0 : index
    %c0_13 = arith.constant 0 : index
    %13 = vector.load %arg4[%c0_12, %c0_13] : memref<128x128xbf16, #tpu.memory_space<vmem>>, vector<128x128xbf16>
    %cst_14 = arith.constant dense<0.000000e+00> : vector<16x128xf32>
    %14 = tpu.matmul %12, %13, %cst_14 {dimension_numbers = #tpu.dot_dimension_numbers<[1], [0], [0], [1], [0, 0, 1, 1], [], []>} : vector<16x128xbf16>, vector<128x128xbf16>, vector<16x128xf32> -> vector<16x128xf32>
    %15 = arith.addf %10, %14 : vector<16x128xf32>
    %c0_15 = arith.constant 0 : index
    %c0_16 = arith.constant 0 : index
    %16 = vector.load %arg13[%c0_15, %c0_16] : memref<16x128xf32, #tpu.memory_space<vmem>>, vector<16x128xf32>
    tpu.vector_store %arg13[%c0_15, %c0_16], %15 {strides = array<i32>} : memref<16x128xf32, #tpu.memory_space<vmem>>, vector<16x128xf32>,
    %c1_i32 = arith.constant 1 : i32
    %17 = arith.cmpi eq, %arg0, %c1_i32 : i32
    %18 = arith.extui %17 : i1 to i32
    %c0_i32_17 = arith.constant 0 : i32
    %19 = arith.cmpi ne, %18, %c0_i32_17 : i32
    scf.if %19 {
      %c0_18 = arith.constant 0 : index
      %c0_19 = arith.constant 0 : index
      %20 = vector.load %arg12[%c0_18, %c0_19] : memref<16x128xf32, #tpu.memory_space<vmem>>, vector<16x128xf32>
      %c0_20 = arith.constant 0 : index
      %c0_21 = arith.constant 0 : index
      %21 = vector.load %arg5[%c0_20, %c0_21] : memref<1x128xf32, #tpu.memory_space<vmem>>, vector<1x128xf32>
      %22 = vector.broadcast %21 : vector<1x128xf32> to vector<16x128xf32>
      %23 = arith.addf %20, %22 : vector<16x128xf32>
      %cst_22 = arith.constant 0.000000e+00 : f32
      %24 = vector.broadcast %cst_22 : f32 to vector<16x128xf32>
      %25 = arith.maximumf %23, %24 : vector<16x128xf32>
      %c0_23 = arith.constant 0 : index
      %c0_24 = arith.constant 0 : index
      %26 = vector.load %arg13[%c0_23, %c0_24] : memref<16x128xf32, #tpu.memory_space<vmem>>, vector<16x128xf32>
      %c0_25 = arith.constant 0 : index
      %c0_26 = arith.constant 0 : index
      %27 = vector.load %arg6[%c0_25, %c0_26] : memref<1x128xf32, #tpu.memory_space<vmem>>, vector<1x128xf32>
      %28 = vector.broadcast %27 : vector<1x128xf32> to vector<16x128xf32>
      %29 = arith.addf %26, %28 : vector<16x128xf32>
      %cst_27 = arith.constant 0.000000e+00 : f32
      %30 = vector.broadcast %cst_27 : f32 to vector<16x128xf32>
      %31 = arith.maximumf %29, %30 : vector<16x128xf32>
      %c0_28 = arith.constant 0 : index
      %c0_29 = arith.constant 0 : index
      %32 = vector.load %arg11[%c0_28, %c0_29] : memref<16x128xf32, #tpu.memory_space<vmem>>, vector<16x128xf32>
      tpu.vector_store %arg11[%c0_28, %c0_29], %31 {strides = array<i32>} : memref<16x128xf32, #tpu.memory_space<vmem>>, vector<16x128xf32>,
      %33 = arith.truncf %25 : vector<16x128xf32> to vector<16x128xbf16>
      %c0_30 = arith.constant 0 : index
      %c0_31 = arith.constant 0 : index
      %34 = vector.load %arg7[%c0_30, %c0_31] : memref<128x256xbf16, #tpu.memory_space<vmem>>, vector<128x256xbf16>
      %cst_32 = arith.constant dense<0.000000e+00> : vector<16x256xf32>
      %35 = tpu.matmul %33, %34, %cst_32 {dimension_numbers = #tpu.dot_dimension_numbers<[1], [0], [0], [1], [0, 0, 1, 1], [], []>} : vector<16x128xbf16>, vector<128x256xbf16>, vector<16x256xf32> -> vector<16x256xf32>
      %c0_33 = arith.constant 0 : index
      %c0_34 = arith.constant 0 : index
      %36 = vector.load %arg8[%c0_33, %c0_34] : memref<1x256xf32, #tpu.memory_space<vmem>>, vector<1x256xf32>
      %37 = vector.broadcast %36 : vector<1x256xf32> to vector<16x256xf32>
      %38 = arith.addf %35, %37 : vector<16x256xf32>
      %39 = vector.extract_strided_slice %38 {offsets = [0, 0], sizes = [16, 128], strides = [1, 1]} : vector<16x256xf32> to vector<16x128xf32>
      %c0_35 = arith.constant 0 : index
      %c0_36 = arith.constant 0 : index
      %40 = vector.load %arg9[%c0_35, %c0_36] : memref<16x128xf32, #tpu.memory_space<vmem>>, vector<16x128xf32>
      tpu.vector_store %arg9[%c0_35, %c0_36], %39 {strides = array<i32>} : memref<16x128xf32, #tpu.memory_space<vmem>>, vector<16x128xf32>,
      %41 = vector.extract_strided_slice %38 {offsets = [0, 128], sizes = [16, 128], strides = [1, 1]} : vector<16x256xf32> to vector<16x128xf32>
      %42 = arith.mulf %41, %41 : vector<16x128xf32>
      %cst_37 = arith.constant dense<0.000000e+00> : vector<16xf32>
      %43 = vector.multi_reduction <add>, %42, %cst_37 [1] : vector<16x128xf32> to vector<16xf32>
      %44 = vector.shape_cast %43 : vector<16xf32> to vector<16x1xf32>
      %cst_38 = arith.constant 1.000000e-24 : f32
      %45 = vector.broadcast %cst_38 : f32 to vector<16x1xf32>
      %46 = arith.maximumf %44, %45 : vector<16x1xf32>
      %47 = math.rsqrt %46 : vector<16x1xf32>
      %48 = vector.broadcast %47 : vector<16x1xf32> to vector<16x128xf32>
      %49 = arith.mulf %41, %48 : vector<16x128xf32>
      %c0_39 = arith.constant 0 : index
      %c0_40 = arith.constant 0 : index
      %50 = vector.load %arg10[%c0_39, %c0_40] : memref<16x128xf32, #tpu.memory_space<vmem>>, vector<16x128xf32>
      tpu.vector_store %arg10[%c0_39, %c0_40], %49 {strides = array<i32>} : memref<16x128xf32, #tpu.memory_space<vmem>>, vector<16x128xf32>,
    } else {
    }
    return
  }
  func.func @transform_0(%arg0: i32) -> (i32, i32) {
    %c0_i32 = arith.constant 0 : i32
    %c0_i32_0 = arith.constant 0 : i32
    return %c0_i32, %arg0 : i32, i32
  }
  func.func @transform_1(%arg0: i32) -> (i32, i32) {
    %c0_i32 = arith.constant 0 : i32
    %c0_i32_0 = arith.constant 0 : i32
    return %c0_i32, %arg0 : i32, i32
  }
  func.func @transform_2(%arg0: i32) -> (i32, i32) {
    %c0_i32 = arith.constant 0 : i32
    %c0_i32_0 = arith.constant 0 : i32
    return %arg0, %c0_i32 : i32, i32
  }
  func.func @transform_3(%arg0: i32) -> (i32, i32) {
    %c0_i32 = arith.constant 0 : i32
    %c0_i32_0 = arith.constant 0 : i32
    return %arg0, %c0_i32 : i32, i32
  }
  func.func @transform_4(%arg0: i32) -> (i32, i32) {
    %c0_i32 = arith.constant 0 : i32
    %c0_i32_0 = arith.constant 0 : i32
    %c0_i32_1 = arith.constant 0 : i32
    return %c0_i32, %c0_i32_0 : i32, i32
  }
  func.func @transform_5(%arg0: i32) -> (i32, i32) {
    %c0_i32 = arith.constant 0 : i32
    %c0_i32_0 = arith.constant 0 : i32
    %c0_i32_1 = arith.constant 0 : i32
    return %c0_i32, %c0_i32_0 : i32, i32
  }
  func.func @transform_6(%arg0: i32) -> (i32, i32) {
    %c0_i32 = arith.constant 0 : i32
    %c0_i32_0 = arith.constant 0 : i32
    %c0_i32_1 = arith.constant 0 : i32
    return %c0_i32, %c0_i32_0 : i32, i32
  }
  func.func @transform_7(%arg0: i32) -> (i32, i32) {
    %c0_i32 = arith.constant 0 : i32
    %c0_i32_0 = arith.constant 0 : i32
    %c0_i32_1 = arith.constant 0 : i32
    return %c0_i32, %c0_i32_0 : i32, i32
  }
  func.func @transform_8(%arg0: i32) -> (i32, i32) {
    %c0_i32 = arith.constant 0 : i32
    %c0_i32_0 = arith.constant 0 : i32
    %c0_i32_1 = arith.constant 0 : i32
    return %c0_i32, %c0_i32_0 : i32, i32
  }
  func.func @transform_9(%arg0: i32) -> (i32, i32) {
    %c0_i32 = arith.constant 0 : i32
    %c0_i32_0 = arith.constant 0 : i32
    %c0_i32_1 = arith.constant 0 : i32
    return %c0_i32, %c0_i32_0 : i32, i32
  }
  func.func @transform_10(%arg0: i32) -> (i32, i32) {
    %c0_i32 = arith.constant 0 : i32
    %c0_i32_0 = arith.constant 0 : i32
    %c0_i32_1 = arith.constant 0 : i32
    return %c0_i32, %c0_i32_0 : i32, i32
  }
}

module attributes {stable_mosaic.version = 11 : i64} {
  func.func @_linear_l2norm_kernel(%arg0: i32, %arg1: memref<32x128xf32, #tpu.memory_space<vmem>>, %arg2: memref<128x128xbf16, #tpu.memory_space<vmem>>, %arg3: memref<1x128xf32, #tpu.memory_space<vmem>>, %arg4: memref<32x128xf32, #tpu.memory_space<vmem>>) attributes {dimension_semantics = [#tpu.dimension_semantics<parallel>], iteration_bounds = array<i64: 2>, scalar_prefetch = 0 : i64, scratch_operands = 0 : i64, tpu.core_type = #tpu.core_type<tc>, window_params = [{transform_indices = @transform_0, window_bounds = array<i64: 32, 128>}, {pipeline_mode = #tpu.pipeline_mode<synchronous>, transform_indices = @transform_1, window_bounds = array<i64: 128, 128>}, {pipeline_mode = #tpu.pipeline_mode<synchronous>, transform_indices = @transform_2, window_bounds = array<i64: 1, 128>}, {transform_indices = @transform_3, window_bounds = array<i64: 32, 128>}]} {
    %c0 = arith.constant 0 : index
    %c0_0 = arith.constant 0 : index
    %0 = vector.load %arg1[%c0, %c0_0] : memref<32x128xf32, #tpu.memory_space<vmem>>, vector<32x128xf32>
    %1 = arith.truncf %0 : vector<32x128xf32> to vector<32x128xbf16>
    %c0_1 = arith.constant 0 : index
    %c0_2 = arith.constant 0 : index
    %2 = vector.load %arg2[%c0_1, %c0_2] : memref<128x128xbf16, #tpu.memory_space<vmem>>, vector<128x128xbf16>
    %cst = arith.constant dense<0.000000e+00> : vector<32x128xf32>
    %3 = tpu.matmul %1, %2, %cst {dimension_numbers = #tpu.dot_dimension_numbers<[1], [0], [0], [1], [0, 0, 1, 1], [], []>} : vector<32x128xbf16>, vector<128x128xbf16>, vector<32x128xf32> -> vector<32x128xf32>
    %c0_3 = arith.constant 0 : index
    %c0_4 = arith.constant 0 : index
    %4 = vector.load %arg3[%c0_3, %c0_4] : memref<1x128xf32, #tpu.memory_space<vmem>>, vector<1x128xf32>
    %5 = vector.broadcast %4 : vector<1x128xf32> to vector<32x128xf32>
    %6 = arith.addf %3, %5 : vector<32x128xf32>
    %7 = arith.mulf %6, %6 : vector<32x128xf32>
    %cst_5 = arith.constant dense<0.000000e+00> : vector<32xf32>
    %8 = vector.multi_reduction <add>, %7, %cst_5 [1] : vector<32x128xf32> to vector<32xf32>
    %9 = vector.shape_cast %8 : vector<32xf32> to vector<32x1xf32>
    %cst_6 = arith.constant 1.000000e-24 : f32
    %10 = vector.broadcast %cst_6 : f32 to vector<32x1xf32>
    %11 = arith.maximumf %9, %10 : vector<32x1xf32>
    %12 = math.rsqrt %11 : vector<32x1xf32>
    %13 = vector.broadcast %12 : vector<32x1xf32> to vector<32x128xf32>
    %14 = arith.mulf %6, %13 : vector<32x128xf32>
    %c0_7 = arith.constant 0 : index
    %c0_8 = arith.constant 0 : index
    %15 = vector.load %arg4[%c0_7, %c0_8] : memref<32x128xf32, #tpu.memory_space<vmem>>, vector<32x128xf32>
    tpu.vector_store %arg4[%c0_7, %c0_8], %14 {strides = array<i32>} : memref<32x128xf32, #tpu.memory_space<vmem>>, vector<32x128xf32>,
    return
  }
  func.func @transform_0(%arg0: i32) -> (i32, i32) {
    %c0_i32 = arith.constant 0 : i32
    %c0_i32_0 = arith.constant 0 : i32
    return %arg0, %c0_i32 : i32, i32
  }
  func.func @transform_1(%arg0: i32) -> (i32, i32) {
    %c0_i32 = arith.constant 0 : i32
    %c0_i32_0 = arith.constant 0 : i32
    %c0_i32_1 = arith.constant 0 : i32
    return %c0_i32, %c0_i32_0 : i32, i32
  }
  func.func @transform_2(%arg0: i32) -> (i32, i32) {
    %c0_i32 = arith.constant 0 : i32
    %c0_i32_0 = arith.constant 0 : i32
    %c0_i32_1 = arith.constant 0 : i32
    return %c0_i32, %c0_i32_0 : i32, i32
  }
  func.func @transform_3(%arg0: i32) -> (i32, i32) {
    %c0_i32 = arith.constant 0 : i32
    %c0_i32_0 = arith.constant 0 : i32
    return %arg0, %c0_i32 : i32, i32
  }
}

</mosaic_0001>

<bundles_post_ra>
// kernel: moco_train_forward.4
= control target key start
LH: loop header
LB: loop body
LE: loop exit
PB: predicated region body
PF: predicated region fallthrough
CT: control target
= control target key end

     0   :  { %s95_s0 = inlined_call_operand.<no memory space> [shape: s32[1], index: 0, kind: input, shape index: {}]   ;;  %s96_s1 = inlined_call_operand.vmem [shape: f32[64,128], index: 1, kind: input, shape index: {}, may-alias: {1,3}]   ;;  %s97_s2 = inlined_call_operand.vmem [shape: f32[4,128], index: 2, kind: input, shape index: {}]   ;;  %s98_s3 = inlined_call_operand.vmem [shape: f32[64,128], index: 3, kind: output, shape index: {}, may-alias: {1,3}]  }
   0x1   :  { %s14_s16 = scalar_lea.vmem %s98_s3, %s95_s0  ;;  %v29_v0 = vld [vmem:[%s97_s2] sm:$0xf] }
   0x2   :  { %30 = vst [vmem:[%s14_s16] sm:$0xf] %v29_v0 }
   0x3   :  { %48 = vsyncadd [#allocation2], 64 }
   0x4   :  { %64 = dma.done.wait [#allocation2], 64 }
   0x5   :  { %65 = vsyncadd [#allocation2], 4294967232 }
   0x6   :  { %52 = vsyncmov [#allocation2] }
   0x9   :  { %s53_s1 = vpop.sfrf %52 }
   0xa   :  { %p63_p0 = scmp.ne.s32.totalorder %s53_s1, 0 }
   0xc   :  { %57 = shalt.err (%p63_p0)  }

// kernel: moco_train_forward.5
= control target key start
LH: loop header
LB: loop body
LE: loop exit
PB: predicated region body
PF: predicated region fallthrough
CT: control target
= control target key end

     0   :  { %s491_s12 = smov 0   ;;  %s547_s0 = inlined_call_operand.vmem [shape: f32[64,128], index: 0, kind: input, shape index: {}]   ;;  %s548_s1 = inlined_call_operand.vmem [shape: bf16[128,128], index: 1, kind: input, shape index: {}]   ;;  %s549_s2 = inlined_call_operand.vmem [shape: f32[1,128], index: 2, kind: input, shape index: {}]   ;;  %s550_s3 = inlined_call_operand.vmem [shape: f32[64,128], index: 3, kind: output, shape index: {}]  }
   0x1 LB: > { %s387_s13 = sadd.s32 4294967295, %s469_s12   ;;  %p391_p0 = scmp.ge.s32.totalorder %s469_s12, 1  ;;  %s469_s12 = sphi %s491_s12, %s13_s12  }
   0x2   : > { %p138_p1 = scmp.lt.s32.totalorder %s469_s12, 3 }
   0x4   : > { %p139_p2 = pnand %p391_p0, %p138_p1 }
   0x5   : > { %s392_s20 = sshll.u32 (!%p139_p2), %s387_s13, 2 }
   0x6   : > { %142 = sbr.rel (%p139_p2) target bundleno = 321 (0x141), region = 32  ;;  %p163_p3 = scmp.lt.s32.totalorder (!%p139_p2), %s392_s20, 7 }
   0xb   : > { %v437_v0 = vld [vmem:[%s548_s1 + $0x38] sm:$0xff]  ;;  %v436_v1 = vld [vmem:[%s548_s1 + $0x30] sm:$0xff]  ;;  %v435_v2 = vld [vmem:[%s548_s1 + $0x28] sm:$0xff]  ;;  %s552_s20 = smov (!%p163_p3, %s392_s20), 7 }
   0xc   : > { %248 = vmatpush.bf16.msra.mxu0 %v437_v0  ;;  %438 = vmatpush.bf16.msra.mxu1 %v437_v0  ;;  %v434_v3 = vld [vmem:[%s548_s1 + $0x20] sm:$0xff]  ;;  %v433_v4 = vld [vmem:[%s548_s1 + $0x18] sm:$0xff]  ;;  %v432_v5 = vld [vmem:[%s548_s1 + $0x10] sm:$0xff]  ;;  %s393_s27 = sshll.u32 %s552_s20, 3 }
   0xd   : > { %v431_v6 = vld [vmem:[%s548_s1 + $0x8] sm:$0xff]  ;;  %s166_s5 = scalar_lea.vmem %s547_s0, %s393_s27  ;;  %v430_v7 = vld [vmem:[%s548_s1] sm:$0xff]  ;;  %s172_s13 = scalar_lea.vmem %s550_s3, %s393_s27 }
   0xe   : > { %v174_v8 = vld [vmem:[%s166_s5] sm:$0xff]  ;;  %v175_v9 = vld [vmem:[%s166_s5 + $0x8] sm:$0xff]  ;;  %v176_v10 = vld [vmem:[%s166_s5 + $0x10] sm:$0xff] }
   0xf   : > { %v177_v11 = vld [vmem:[%s166_s5 + $0x18] sm:$0xff]  ;;  %v178_v12 = vpack.c.bf16 %v175_v9, %v174_v8  ;;  %v454_v14 = vld [vmem:[%s549_s2] ss:$0 sm:$0xff] }
  0x10   : > { %249 = vmatpush.bf16.msra.mxu0 %v436_v1  ;;  %439 = vmatpush.bf16.msra.mxu1 %v436_v1  ;;  %v179_v13 = vpack.c.bf16 %v177_v11, %v176_v10 }
  0x14   : > { %250 = vmatpush.bf16.msra.mxu0 %v435_v2  ;;  %440 = vmatpush.bf16.msra.mxu1 %v435_v2 }
  0x18   : > { %251 = vmatpush.bf16.msra.mxu0 %v434_v3  ;;  %441 = vmatpush.bf16.msra.mxu1 %v434_v3 }
  0x1c   : > { %252 = vmatpush.bf16.msra.mxu0 %v433_v4  ;;  %442 = vmatpush.bf16.msra.mxu1 %v433_v4 }
  0x20   : > { %253 = vmatpush.bf16.msra.mxu0 %v432_v5  ;;  %443 = vmatpush.bf16.msra.mxu1 %v432_v5 }
  0x24   : > { %254 = vmatpush.bf16.msra.mxu0 %v431_v6  ;;  %444 = vmatpush.bf16.msra.mxu1 %v431_v6 }
  0x28   : > { %255 = vmatpush.bf16.msra.mxu0 %v430_v7  ;;  %445 = vmatpush.bf16.msra.mxu1 %v430_v7 }
  0x2b   : > { %256 = vmatmul.bf16.vlgmr.msra.gmra.mxu0 %v178_v12  ;;  %261 = vmatmul.bf16.vlgmr.msra.gmra.mxu1 %v179_v13 }
  0xa8   : > { %v257_v15 = vpop.f32.mrf.mxu0  ;;  %v262_v16 = vpop.f32.mrf.mxu1 }
  0xa9   : > { %v258_v17 = vadd.f32 %v454_v14, %v257_v15  ;;  %v534_v18 = vadd.f32 %v454_v14, %v262_v16 }
  0xab   : > { %v269_v19 = vmul.f32 %v534_v18, %v534_v18  ;;  %v267_v20 = vmul.f32 %v258_v17, %v258_v17 }
  0xad   : > { %275 = vadd.xlane.f32.xlu1 %v269_v19  ;;  %271 = vadd.xlane.f32.xlu0 %v267_v20 }
  0xb0   : > { %v259_v21 = vpop.f32.mrf.mxu0  ;;  %v264_v22 = vpop.f32.mrf.mxu1 }
  0xb1   : > { %v260_v23 = vadd.f32 %v454_v14, %v259_v21  ;;  %v265_v24 = vadd.f32 %v454_v14, %v264_v22 }
  0xb3   : > { %v270_v25 = vmul.f32 %v265_v24, %v265_v24  ;;  %v268_v26 = vmul.f32 %v260_v23, %v260_v23 }
  0xb5   : > { %277 = vadd.xlane.f32.xlu1 %v270_v25  ;;  %273 = vadd.xlane.f32.xlu0 %v268_v26 }
 0x120   : > { %v276_v27 = vpop.xlane.xlu1 %275  ;;  %v272_v28 = vpop.xlane.xlu0 %271 }
 0x121   : > { %v281_v29 = vmax.f32 %v276_v27, 1e-24  ;;  %v279_v30 = vmax.f32 %v272_v28, 1e-24 }
 0x123   : > { %455 = vrsqrt.f32 %v281_v29  ;;  %vm289_vm1 = vweird.f32 %v279_v30  ;;  %vm309_vm5 = vweird.f32 %v281_v29 }
 0x124   : > { %457 = vrsqrt.f32 %v279_v30 }
 0x128   : > { %v278_v31 = vpop.xlane.xlu1 %277  ;;  %v274_v32 = vpop.xlane.xlu0 %273 }
 0x129   : > { %v456_v33 = vpop.eup %455  ;;  %v282_v34 = vmax.f32 %v278_v31, 1e-24  ;;  %v280_v35 = vmax.f32 %v274_v32, 1e-24 }
 0x12a   : > { %v458_v36 = vpop.eup %457  ;;  %v304_v37 = vmul.f32 %v456_v33, %v281_v29  ;;  %vm310_vm3 = vweird.f32 %v456_v33 }
 0x12b   : > { %v284_v38 = vmul.f32 %v458_v36, %v279_v30  ;;  %459 = vrsqrt.f32 %v282_v34  ;;  %vm290_vm0 = vweird.f32 %v458_v36  ;;  %vm311_vm7 = vmor %vm309_vm5, %vm310_vm3  ;;  %vm319_vm8 = vweird.f32 %v282_v34 }
 0x12c   : > { %v305_v39 = vmul.f32 %v456_v33, %v304_v37  ;;  %461 = vrsqrt.f32 %v280_v35  ;;  %vm291_vm2 = vmor %vm289_vm1, %vm290_vm0  ;;  %vm299_vm10 = vweird.f32 %v280_v35 }
 0x12d   : > { %v285_v40 = vmul.f32 %v458_v36, %v284_v38 }
 0x12e   : > { %v306_v42 = vmul.f32 0.5, %v305_v39 }
 0x12f   : > { %v286_v41 = vmul.f32 0.5, %v285_v40 }
 0x130   : > { %v307_v49 = vsub.f32 1.5, %v306_v42 }
 0x131   : > { %v460_v43 = vpop.eup %459  ;;  %v287_v44 = vsub.f32 1.5, %v286_v41 }
 0x132   : > { %v462_v45 = vpop.eup %461  ;;  %v314_v46 = vmul.f32 %v460_v43, %v282_v34  ;;  %v308_v56 = vmul.f32 %v456_v33, %v307_v49  ;;  %vm320_vm4 = vweird.f32 %v460_v43 }
 0x133   : > { %v288_v47 = vmul.f32 %v458_v36, %v287_v44  ;;  %v294_v48 = vmul.f32 %v462_v45, %v280_v35  ;;  %vm300_vm6 = vweird.f32 %v462_v45  ;;  %vm321_vm9 = vmor %vm319_vm8, %vm320_vm4 }
 0x134   : > { %v315_v50 = vmul.f32 %v460_v43, %v314_v46  ;;  %v312_v61 = vsel %vm311_vm7, %v456_v33, %v308_v56  ;;  %vm301_vm11 = vmor %vm299_vm10, %vm300_vm6 }
 0x135   : > { %v292_v51 = vsel %vm291_vm2, %v458_v36, %v288_v47  ;;  %v295_v52 = vmul.f32 %v462_v45, %v294_v48  ;;  %v325_v1 = vmul.f32 %v312_v61, %v534_v18 }
 0x136   : > { %v323_v53 = vmul.f32 %v292_v51, %v258_v17  ;;  %v316_v54 = vmul.f32 0.5, %v315_v50 }
 0x137   : > { %v296_v55 = vmul.f32 0.5, %v295_v52  ;;  %329 = vst [vmem:[%s172_s13 + $0x10] sm:$0xff] %v325_v1 }
 0x138   : > { %327 = vst [vmem:[%s172_s13] sm:$0xff] %v323_v53  ;;  %v317_v57 = vsub.f32 1.5, %v316_v54 }
 0x139   : > { %v297_v58 = vsub.f32 1.5, %v296_v55 }
 0x13a   : > { %v318_v59 = vmul.f32 %v460_v43, %v317_v57 }
 0x13b   : > { %v298_v60 = vmul.f32 %v462_v45, %v297_v58 }
 0x13c   : > { %v322_v62 = vsel %vm321_vm9, %v460_v43, %v318_v59 }
 0x13d   : > { %v302_v63 = vsel %vm301_vm11, %v462_v45, %v298_v60  ;;  %v326_v2 = vmul.f32 %v322_v62, %v265_v24 }
 0x13e   : > { %v324_v0 = vmul.f32 %v302_v63, %v260_v23 }
 0x13f   : > { %330 = vst [vmem:[%s172_s13 + $0x18] sm:$0xff] %v326_v2 }
 0x140   : > { %328 = vst [vmem:[%s172_s13 + $0x8] sm:$0xff] %v324_v0 }
 0x141 PF: > { %s13_s12 = sadd.s32 1, %s469_s12  }
 0x142   : > { %p10_p4 = scmp.ge.s32.totalorder %s13_s12, 4  }
 0x144   :  { %12 = sbr.rel (!%p10_p4) target bundleno = 1 (0x1), region = 62 }

// kernel: moco_train_forward.3
= control target key start
LH: loop header
LB: loop body
LE: loop exit
PB: predicated region body
PF: predicated region fallthrough
CT: control target
= control target key end

     0   :  { %s1232_s13 = smov 0   ;;  %s1234_s14 = smov 0   ;;  %s1458_s0 = inlined_call_operand.vmem [shape: f32[16,256], index: 0, kind: input, shape index: {}]   ;;  %s1459_s1 = inlined_call_operand.vmem [shape: f32[16,256], index: 1, kind: input, shape index: {}]   ;;  %s1460_s2 = inlined_call_operand.vmem [shape: bf16[256,128], index: 2, kind: input, shape index: {}]   ;;  %s1461_s3 = inlined_call_operand.vmem [shape: bf16[256,128], index: 3, kind: input, shape index: {}]   ;;  %s1462_s4 = inlined_call_operand.vmem [shape: f32[1,128], index: 4, kind: input, shape index: {}]   ;;  %s1463_s5 = inlined_call_operand.vmem [shape: f32[1,128], index: 5, kind: input, shape index: {}]   ;;  %s1464_s6 = inlined_call_operand.vmem [shape: bf16[128,256], index: 6, kind: input, shape index: {}]   ;;  %s1465_s7 = inlined_call_operand.vmem [shape: f32[1,256], index: 7, kind: input, shape index: {}]   ;;  %s1466_s8 = inlined_call_operand.vmem [shape: f32[16,128], index: 8, kind: output, shape index: {0}]   ;;  %s1467_s9 = inlined_call_operand.vmem [shape: f32[16,128], index: 9, kind: output, shape index: {1}]   ;;  %s1468_s10 = inlined_call_operand.vmem [shape: f32[16,128], index: 10, kind: output, shape index: {2}]  }
   0x1   :  { %s1236_s15 = smov 0  }
   0x2 LB: > { %s1248_s16 = sadd.s32 4294967295, %s1174_s15   ;;  %s1251_s17 = sadd.s32 1, %s1174_s15   ;;  %s1174_s15 = sphi %s1236_s15, %s1472_s15   ;;  %s1170_s14 = sphi %s1234_s14, %s1471_s14   ;;  %s1166_s13 = sphi %s1232_s13, %s1470_s13  }
   0x3   : > { %s25_s18 = ssub.s32 %s1174_s15, %s1251_s17  ;;  %s28_s19 = sadd.s32 1, %s1170_s14 }
   0x4   : > { %p26_p0 = scmp.eq.s32.totalorder %s25_s18, 0  ;;  %p35_p1 = scmp.ne.s32.totalorder %s1170_s14, %s1166_s13 }
   0x5   : > { %p36_p2 = scmp.eq.s32.totalorder %s1174_s15, 0  ;;  %p945_p4 = scmp.ge.s32.totalorder %s1174_s15, 2 }
   0x6   : > { %s1260_s20 = scalar_select %p26_p0, %s1170_s14, %s28_s19  }
   0x7   : > { %p1262_p3 = por %p36_p2, %p35_p1  ;;  %298 = sbr.rel (%p945_p4) target bundleno = 24 (0x18), region = 32 }
   0xc   : > { %301 = sbr.rel (!%p1262_p3) target bundleno = 18 (0x12), region = 36  ;;  %s303_s22 = sand.u32 (%p1262_p3), 1, %s1170_s14  }
   0xd   : > { %s947_s23 = sshll.u32 (%p1262_p3), %s1174_s15, 3  ;;  %s946_s24 = sshll.u32 (%p1262_p3), %s303_s22, 4 }
   0xe   : > { %s307_s27 = scalar_lea.vmem (%p1262_p3), %s1458_s0, %s947_s23  ;;  %s305_s28 = scalar_lea.vmem (%p1262_p3), [#allocation4], %s946_s24 }
   0xf   : > { %v338_v0 = vld [vmem:[%s307_s27] sm:$0xff] (%p1262_p3)  ;;  %v340_v1 = vld [vmem:[%s307_s27 + $0x10] sm:$0xff] (%p1262_p3) }
  0x10   : > { %339 = vst [vmem:[%s305_s28] sm:$0xff] (%p1262_p3), %v338_v0 }
  0x11   : > { %341 = vst [vmem:[%s305_s28 + $0x8] sm:$0xff] %v340_v1 }
  0x12 PF: > { %347 = sbr.rel (!%p1262_p3) target bundleno = 24 (0x18), region = 74  ;;  %s349_s29 = sand.u32 (%p1262_p3), 1, %s1170_s14  }
  0x13   : > { %s949_s30 = sshll.u32 (%p1262_p3), %s1174_s15, 3  ;;  %s948_s11 = sshll.u32 (%p1262_p3), %s349_s29, 4 }
  0x14   : > { %s353_s19 = scalar_lea.vmem (%p1262_p3), %s1459_s1, %s949_s30  ;;  %s351_s22 = scalar_lea.vmem (%p1262_p3), [#allocation5], %s948_s11 }
  0x15   : > { %v384_v2 = vld [vmem:[%s353_s19] sm:$0xff] (%p1262_p3)  ;;  %v386_v3 = vld [vmem:[%s353_s19 + $0x10] sm:$0xff] (%p1262_p3) }
  0x16   : > { %385 = vst [vmem:[%s351_s22] sm:$0xff] (%p1262_p3), %v384_v2 }
  0x17   : > { %387 = vst [vmem:[%s351_s22 + $0x8] sm:$0xff] %v386_v3 }
  0x18 PF: > { %p950_p5 = scmp.ge.s32.totalorder %s1174_s15, 1  ;;  %p410_p6 = scmp.lt.s32.totalorder %s1174_s15, 3 }
  0x1a   : > { %p411_p7 = pnand %p950_p5, %p410_p6 }
  0x1b   : > { %s417_s21 = sand.u32 (!%p411_p7), 1, %s1166_s13   ;;  %s953_s23 = sshll.u32 (!%p411_p7), %s1248_s16, 4 }
  0x1c   : > { %414 = sbr.rel (%p411_p7) target bundleno = 524 (0x20c), region = 120  ;;  %s1285_s24 = sshll.u32 (!%p411_p7), %s417_s21, 4 }
  0x1d   : > { %p471_p8 = scmp.lt.s32.totalorder (!%p411_p7), %s953_s23, 31  ;;  %s419_s11 = scalar_lea.vmem (!%p411_p7), [#allocation4], %s1285_s24 }
  0x1e   : > { %s426_s13 = scalar_lea.vmem (!%p411_p7), [#allocation5], %s1285_s24  ;;  %p957_p9 = scmp.ne.s32.totalorder (!%p411_p7), %s1248_s16, 0 }
  0x21   : > { %s1474_s23 = smov (!%p471_p8, %s953_s23), 31  ;;  %485 = sbr.rel (%p957_p9) target bundleno = 43 (0x2b), region = 132 }
  0x22   : > { %s954_s25 = sshll.u32 %s1474_s23, 2 }
  0x23   : > { %s1290_s28 = scalar_lea.vmem %s1460_s2, %s954_s25  ;;  %s1295_s30 = scalar_lea.vmem %s1461_s3, %s954_s25 }
  0x26   : > { %v1176_v4 = vmov 0.0  }
  0x27   : > { %486 = vst [vmem:[#allocation2] sm:$0xff] %v1176_v4 }
  0x28   : > { %487 = vst [vmem:[#allocation2 + $0x8] sm:$0xff] %v1176_v4 }
  0x29   : > { %488 = vst [vmem:[#allocation3 + $0x8] sm:$0xff] %v1176_v4 }
  0x2a   : > { %489 = vst [vmem:[#allocation3] sm:$0xff] %v1176_v4 }
  0x2b PF: > { %v1096_v5 = vld [vmem:[%s1290_s28 + $0x38] sm:$0xff]  ;;  %v1095_v7 = vld [vmem:[%s1290_s28 + $0x30] sm:$0xff]  ;;  %v1094_v9 = vld [vmem:[%s1290_s28 + $0x28] sm:$0xff]  ;;  %p1022_p10 = scmp.ne.s32.totalorder %s1248_s16, 1 }
  0x2c   : > { %v1104_v6 = vld [vmem:[%s1295_s30 + $0x38] sm:$0xff]  ;;  %559 = vmatpush.bf16.msra.mxu0 %v1096_v5  ;;  %v1103_v8 = vld [vmem:[%s1295_s30 + $0x30] sm:$0xff]  ;;  %v1102_v10 = vld [vmem:[%s1295_s30 + $0x28] sm:$0xff] }
  0x2d   : > { %646 = vmatpush.bf16.msra.mxu1 %v1104_v6  ;;  %v1093_v11 = vld [vmem:[%s1290_s28 + $0x20] sm:$0xff]  ;;  %v1092_v13 = vld [vmem:[%s1290_s28 + $0x18] sm:$0xff]  ;;  %v1091_v15 = vld [vmem:[%s1290_s28 + $0x10] sm:$0xff] }
  0x2e   : > { %v1101_v12 = vld [vmem:[%s1295_s30 + $0x20] sm:$0xff]  ;;  %v1100_v14 = vld [vmem:[%s1295_s30 + $0x18] sm:$0xff]  ;;  %v1099_v16 = vld [vmem:[%s1295_s30 + $0x10] sm:$0xff] }
  0x2f   : > { %v1090_v17 = vld [vmem:[%s1290_s28 + $0x8] sm:$0xff]  ;;  %v1089_v19 = vld [vmem:[%s1290_s28] sm:$0xff] }
  0x30   : > { %560 = vmatpush.bf16.msra.mxu0 %v1095_v7  ;;  %v1098_v18 = vld [vmem:[%s1295_s30 + $0x8] sm:$0xff]  ;;  %v1097_v20 = vld [vmem:[%s1295_s30] sm:$0xff]  ;;  %v577_v28 = vld [vmem:[#allocation3 + $0x8] sm:$0xff] }
  0x31   : > { %647 = vmatpush.bf16.msra.mxu1 %v1103_v8  ;;  %v492_v21 = vld [vmem:[%s419_s11] sm:$0xff]  ;;  %v493_v22 = vld [vmem:[%s419_s11 + $0x8] sm:$0xff] }
  0x32   : > { %v579_v23 = vld [vmem:[%s426_s13] sm:$0xff]  ;;  %v580_v24 = vld [vmem:[%s426_s13 + $0x8] sm:$0xff]  ;;  %v494_v25 = vpack.c.bf16 %v493_v22, %v492_v21 }
  0x33   : > { %v581_v26 = vpack.c.bf16 %v580_v24, %v579_v23  ;;  %v490_v27 = vld [vmem:[#allocation2] sm:$0xff]  ;;  %v491_v33 = vld [vmem:[#allocation2 + $0x8] sm:$0xff]  ;;  %v578_v34 = vld [vmem:[#allocation3] sm:$0xff] }
  0x34   : > { %561 = vmatpush.bf16.msra.mxu0 %v1094_v9 }
  0x35   : > { %648 = vmatpush.bf16.msra.mxu1 %v1102_v10 }
  0x38   : > { %562 = vmatpush.bf16.msra.mxu0 %v1093_v11 }
  0x39   : > { %649 = vmatpush.bf16.msra.mxu1 %v1101_v12 }
  0x3c   : > { %563 = vmatpush.bf16.msra.mxu0 %v1092_v13 }
  0x3d   : > { %650 = vmatpush.bf16.msra.mxu1 %v1100_v14 }
  0x40   : > { %564 = vmatpush.bf16.msra.mxu0 %v1091_v15 }
  0x41   : > { %651 = vmatpush.bf16.msra.mxu1 %v1099_v16 }
  0x44   : > { %565 = vmatpush.bf16.msra.mxu0 %v1090_v17 }
  0x45   : > { %652 = vmatpush.bf16.msra.mxu1 %v1098_v18 }
  0x48   : > { %566 = vmatpush.bf16.msra.mxu0 %v1089_v19 }
  0x49   : > { %653 = vmatpush.bf16.msra.mxu1 %v1097_v20 }
  0x4b   : > { %567 = vmatmul.bf16.vlgmr.msra.gmra.mxu0 %v494_v25 }
  0x4c   : > { %654 = vmatmul.bf16.vlgmr.msra.gmra.mxu1 %v581_v26 }
  0xc8   : > { %v568_v29 = vpop.f32.mrf.mxu0 }
  0xc9   : > { %v655_v30 = vpop.f32.mrf.mxu1  ;;  %v573_v31 = vadd.f32 %v568_v29, %v490_v27 }
  0xca   : > { %v660_v32 = vadd.f32 %v655_v30, %v577_v28 }
  0xcb   : > { %575 = vst [vmem:[#allocation2] sm:$0xff] %v573_v31 }
  0xcc   : > { %662 = vst [vmem:[#allocation3 + $0x8] sm:$0xff] %v660_v32 }
  0xd0   : > { %v570_v35 = vpop.f32.mrf.mxu0  ;;  %667 = sbr.rel (%p1022_p10) target bundleno = 524 (0x20c), region = 136 }
  0xd1   : > { %v657_v36 = vpop.f32.mrf.mxu1  ;;  %v574_v37 = vadd.f32 %v570_v35, %v491_v33 }
  0xd2   : > { %v661_v38 = vadd.f32 %v657_v36, %v578_v34 }
  0xd3   : > { %576 = vst [vmem:[#allocation2 + $0x8] sm:$0xff] %v574_v37 }
  0xd4   : > { %663 = vst [vmem:[#allocation3] sm:$0xff] %v661_v38 }
  0xd5   : > { %v1119_v39 = vld [vmem:[%s1464_s6 + $0x74] sm:$0xf]  ;;  %v1083_v40 = vld [vmem:[%s1464_s6 + $0x78] sm:$0xf0]  ;;  %v1117_v41 = vld [vmem:[%s1464_s6 + $0x64] sm:$0xf] }
  0xd6   : > { %v1086_v42 = vor.u32 %v1119_v39, %v1083_v40  ;;  %v1075_v43 = vld [vmem:[%s1464_s6 + $0x68] sm:$0xf0]  ;;  %v1115_v45 = vld [vmem:[%s1464_s6 + $0x54] sm:$0xf]  ;;  %v1067_v46 = vld [vmem:[%s1464_s6 + $0x58] sm:$0xf0] }
  0xd7   : > { %v1078_v44 = vor.u32 %v1117_v41, %v1075_v43  ;;  %v1113_v47 = vld [vmem:[%s1464_s6 + $0x44] sm:$0xf]  ;;  %v1059_v48 = vld [vmem:[%s1464_s6 + $0x48] sm:$0xf0]  ;;  %v678_v49 = vld [vmem:[#allocation3 + $0x8] sm:$0xff]  ;;  %v1070_v50 = vor.u32 %v1115_v45, %v1067_v46 }
  0xd8   : > { %807 = vmatpush.bf16.msra.mxu1 %v1086_v42  ;;  %v1147_v52 = vld [vmem:[%s1463_s5] ss:$0 sm:$0xff]  ;;  %v1081_v53 = vld [vmem:[%s1464_s6 + $0x70] sm:$0xf]  ;;  %v1120_v54 = vld [vmem:[%s1464_s6 + $0x74] sm:$0xf0]  ;;  %v1062_v60 = vor.u32 %v1113_v47, %v1059_v48 }
  0xd9   : > { %v1073_v55 = vld [vmem:[%s1464_s6 + $0x60] sm:$0xf]  ;;  %v684_v56 = vadd.f32 %v1147_v52, %v678_v49  ;;  %v1082_v58 = vor.u32 %v1120_v54, %v1081_v53  ;;  %v1118_v59 = vld [vmem:[%s1464_s6 + $0x64] sm:$0xf0]  ;;  %v1111_v61 = vld [vmem:[%s1464_s6 + $0x34] sm:$0xf] }
  0xda   : > { %v1074_v0 = vor.u32 %v1118_v59, %v1073_v55  ;;  %v1051_v1 = vld [vmem:[%s1464_s6 + $0x38] sm:$0xf0]  ;;  %v1065_v2 = vld [vmem:[%s1464_s6 + $0x50] sm:$0xf]  ;;  %v1116_v3 = vld [vmem:[%s1464_s6 + $0x54] sm:$0xf0] }
  0xdb   : > { %v679_v51 = vld [vmem:[#allocation3] sm:$0xff]  ;;  %v686_v62 = vmax.f32 %v684_v56, 0.0  ;;  %793 = vmatpush.bf16.msra.mxu0 %v1082_v58  ;;  %v1054_v4 = vor.u32 %v1111_v61, %v1051_v1  ;;  %v1109_v5 = vld [vmem:[%s1464_s6 + $0x24] sm:$0xf]  ;;  %v1066_v6 = vor.u32 %v1116_v3, %v1065_v2  ;;  %v1043_v7 = vld [vmem:[%s1464_s6 + $0x28] sm:$0xf0] }
  0xdc   : > { %808 = vmatpush.bf16.msra.mxu1 %v1078_v44  ;;  %v685_v57 = vadd.f32 %v1147_v52, %v679_v51  ;;  %v1057_v8 = vld [vmem:[%s1464_s6 + $0x40] sm:$0xf]  ;;  %v1114_v9 = vld [vmem:[%s1464_s6 + $0x44] sm:$0xf0]  ;;  %v1046_v11 = vor.u32 %v1109_v5, %v1043_v7  ;;  %v1107_v12 = vld [vmem:[%s1464_s6 + $0x14] sm:$0xf] }
  0xdd   : > { %688 = vst [vmem:[%s1468_s10] sm:$0xff] %v686_v62  ;;  %v1146_v10 = vld [vmem:[%s1462_s4] ss:$0 sm:$0xff]  ;;  %v669_v14 = vld [vmem:[#allocation2 + $0x8] sm:$0xff]  ;;  %v1058_v15 = vor.u32 %v1114_v9, %v1057_v8  ;;  %v1035_v16 = vld [vmem:[%s1464_s6 + $0x18] sm:$0xf0] }
  0xde   : > { %v687_v63 = vmax.f32 %v685_v57, 0.0  ;;  %v668_v13 = vld [vmem:[#allocation2] sm:$0xff]  ;;  %v1049_v17 = vld [vmem:[%s1464_s6 + $0x30] sm:$0xf]  ;;  %v1112_v18 = vld [vmem:[%s1464_s6 + $0x34] sm:$0xf0]  ;;  %v675_v20 = vadd.f32 %v1146_v10, %v669_v14  ;;  %v1038_v21 = vor.u32 %v1107_v12, %v1035_v16 }
  0xdf   : > { %794 = vmatpush.bf16.msra.mxu0 %v1074_v0  ;;  %v674_v19 = vadd.f32 %v1146_v10, %v668_v13  ;;  %v1105_v22 = vld [vmem:[%s1464_s6 + $0x4] sm:$0xf]  ;;  %v1050_v23 = vor.u32 %v1112_v18, %v1049_v17  ;;  %v1027_v24 = vld [vmem:[%s1464_s6 + $0x8] sm:$0xf0]  ;;  %v1041_v25 = vld [vmem:[%s1464_s6 + $0x20] sm:$0xf] }
  0xe0   : > { %809 = vmatpush.bf16.msra.mxu1 %v1070_v50  ;;  %689 = vst [vmem:[%s1468_s10 + $0x8] sm:$0xff] %v687_v63  ;;  %v1110_v26 = vld [vmem:[%s1464_s6 + $0x24] sm:$0xf0]  ;;  %v677_v28 = vmax.f32 %v675_v20, 0.0  ;;  %v1030_v29 = vor.u32 %v1105_v22, %v1027_v24  ;;  %v1033_v31 = vld [vmem:[%s1464_s6 + $0x10] sm:$0xf] }
  0xe1   : > { %v676_v27 = vmax.f32 %v674_v19, 0.0  ;;  %v1042_v30 = vor.u32 %v1110_v26, %v1041_v25  ;;  %v1108_v32 = vld [vmem:[%s1464_s6 + $0x14] sm:$0xf0]  ;;  %v1025_v35 = vld [vmem:[%s1464_s6] sm:$0xf] }
  0xe2   : > { %v1034_v34 = vor.u32 %v1108_v32, %v1033_v31  ;;  %v1106_v36 = vld [vmem:[%s1464_s6 + $0x4] sm:$0xf0]  ;;  %v707_v38 = vld [vmem:[%s1465_s7] sm:$0x3] }
  0xe3   : > { %795 = vmatpush.bf16.msra.mxu0 %v1066_v6  ;;  %v690_v33 = vpack.c.bf16 %v677_v28, %v676_v27  ;;  %v1026_v37 = vor.u32 %v1106_v36, %v1025_v35  ;;  %v710_v39 = vperm.slane %v707_v38, 1  ;;  %v709_v47 = vperm.slane %v707_v38, 0 }
  0xe4   : > { %810 = vmatpush.bf16.msra.mxu1 %v1062_v60 }
  0xe7   : > { %796 = vmatpush.bf16.msra.mxu0 %v1058_v15 }
  0xe8   : > { %811 = vmatpush.bf16.msra.mxu1 %v1054_v4 }
  0xeb   : > { %797 = vmatpush.bf16.msra.mxu0 %v1050_v23 }
  0xec   : > { %812 = vmatpush.bf16.msra.mxu1 %v1046_v11 }
  0xef   : > { %798 = vmatpush.bf16.msra.mxu0 %v1042_v30 }
  0xf0   : > { %813 = vmatpush.bf16.msra.mxu1 %v1038_v21 }
  0xf3   : > { %799 = vmatpush.bf16.msra.mxu0 %v1034_v34 }
  0xf4   : > { %814 = vmatpush.bf16.msra.mxu1 %v1030_v29 }
  0xf7   : > { %815 = vmatmul.bf16.vlgmr.msra.gmra.mxu1 %v690_v33  ;;  %800 = vmatpush.bf16.msra.mxu0 %v1026_v37 }
  0xfa   : > { %801 = vmatmul.bf16.vlgmr.msra.gmra.mxu0 %v690_v33 }
 0x174   : > { %v816_v40 = vpop.f32.mrf.mxu1 }
 0x175   : > { %v817_v41 = vadd.f32 %v816_v40, %v710_v39 }
 0x177   : > { %v823_v42 = vmul.f32 %v817_v41, %v817_v41  ;;  %v802_v46 = vpop.f32.mrf.mxu0 }
 0x178   : > { %v803_v49 = vadd.f32 %v802_v46, %v709_v47 }
 0x179   : > { %825 = vadd.xlane.f32.xlu0 %v823_v42 }
 0x17a   : > { %821 = vst [vmem:[%s1466_s8] sm:$0xff] %v803_v49 }
 0x17c   : > { %v818_v43 = vpop.f32.mrf.mxu1 }
 0x17d   : > { %v819_v44 = vadd.f32 %v818_v43, %v710_v39 }
 0x17f   : > { %v824_v45 = vmul.f32 %v819_v44, %v819_v44  ;;  %v804_v48 = vpop.f32.mrf.mxu0 }
 0x180   : > { %v805_v50 = vadd.f32 %v804_v48, %v709_v47 }
 0x181   : > { %827 = vadd.xlane.f32.xlu0 %v824_v45 }
 0x182   : > { %822 = vst [vmem:[%s1466_s8 + $0x8] sm:$0xff] %v805_v50 }
 0x1ec   : > { %v826_v51 = vpop.xlane.xlu0 %825 }
 0x1ed   : > { %v829_v52 = vmax.f32 %v826_v51, 1e-24 }
 0x1ef   : > { %1148 = vrsqrt.f32 %v829_v52  ;;  %vm837_vm1 = vweird.f32 %v829_v52 }
 0x1f4   : > { %v828_v53 = vpop.xlane.xlu0 %827 }
 0x1f5   : > { %v1149_v54 = vpop.eup %1148  ;;  %v830_v55 = vmax.f32 %v828_v53, 1e-24 }
 0x1f6   : > { %v832_v56 = vmul.f32 %v1149_v54, %v829_v52  ;;  %vm838_vm0 = vweird.f32 %v1149_v54 }
 0x1f7   : > { %1150 = vrsqrt.f32 %v830_v55  ;;  %vm839_vm2 = vmor %vm837_vm1, %vm838_vm0  ;;  %vm847_vm4 = vweird.f32 %v830_v55 }
 0x1f8   : > { %v833_v57 = vmul.f32 %v1149_v54, %v832_v56 }
 0x1fa   : > { %v834_v58 = vmul.f32 0.5, %v833_v57 }
 0x1fc   : > { %v835_v59 = vsub.f32 1.5, %v834_v58 }
 0x1fd   : > { %v1151_v60 = vpop.eup %1150 }
 0x1fe   : > { %v836_v61 = vmul.f32 %v1149_v54, %v835_v59  ;;  %v842_v62 = vmul.f32 %v1151_v60, %v830_v55  ;;  %vm848_vm3 = vweird.f32 %v1151_v60 }
 0x1ff   : > { %vm849_vm5 = vmor %vm847_vm4, %vm848_vm3 }
 0x200   : > { %v840_v63 = vsel %vm839_vm2, %v1149_v54, %v836_v61  ;;  %v843_v0 = vmul.f32 %v1151_v60, %v842_v62 }
 0x201   : > { %v851_v1 = vmul.f32 %v840_v63, %v817_v41 }
 0x202   : > { %v844_v2 = vmul.f32 0.5, %v843_v0 }
 0x203   : > { %853 = vst [vmem:[%s1467_s9] sm:$0xff] %v851_v1 }
 0x204   : > { %v845_v3 = vsub.f32 1.5, %v844_v2 }
 0x206   : > { %v846_v4 = vmul.f32 %v1151_v60, %v845_v3 }
 0x208   : > { %v850_v5 = vsel %vm849_vm5, %v1151_v60, %v846_v4 }
 0x209   : > { %v852_v6 = vmul.f32 %v850_v5, %v819_v44 }
 0x20b   : > { %854 = vst [vmem:[%s1467_s9 + $0x8] sm:$0xff] %v852_v6 }
 0x20c PF: > { %p18_p11 = scmp.ge.s32.totalorder %s1251_s17, 4   ;;  %s1470_s13 = smov %s1170_s14 }
 0x20d   : > { %s1471_s14 = smov %s1260_s20  ;;  %s1472_s15 = smov %s1251_s17 }
 0x20e   :  { %20 = sbr.rel (!%p18_p11) target bundleno = 2 (0x2), region = 197 }

</bundles_post_ra>
